<compile_context>
chip_gen: v7x
topology: tpu7x:2x2x1
jax: 0.10.0
libtpu: 0.0.40
codegen_flags: <defaults>
</compile_context>

<pallas_src>
import math

import jax
import jax.numpy as jnp
from jax.experimental import pallas as pl
from jax.experimental.pallas import tpu as pltpu


# VMEM sizing: keep the double-buffered working set well under the scoped
# limit on every generation (v5e/v6e: 128 MiB physical, v7x: 64 MiB per TC).
_VMEM_LIMIT_BYTES = 48 * 1024 * 1024    # explicit scoped-VMEM limit requested
_TILE_BUDGET_BYTES = 12 * 1024 * 1024   # a-tile + b-tile + out-tile (one copy)
                                        # -> ~24 MiB once double buffered


def _sublane_mult(itemsize: int) -> int:
    # f32 packs 8 rows per vreg, bf16 16, int8/fp8 32.
    return 8 * max(1, 4 // itemsize)


def _pick_tile(extent: int, unit_bytes: int, budget: int, mult: int,
               prefer_split: bool = False) -> int:
    """Largest tile (multiple of `mult`, or the full extent) fitting `budget`."""
    t = max(1, budget // max(unit_bytes, 1))
    if prefer_split and extent >= 2 * mult:
        # Keep at least 2 grid steps so the 'parallel' axis can shard across
        # TensorCores (v7x has 2 TCs/chip).
        t = min(t, -(-extent // 2))
    if t >= extent:
        return extent                       # full extent is always legal
    return max(mult, (t // mult) * mult)    # hardware-aligned tile


def _gtu_split_kernel(a_ref, b_ref, o_ref):
    # a_ref / b_ref blocks hold the two halves already (DMA-side split).
    a = a_ref[...].reshape(o_ref.shape).astype(jnp.float32)
    b = b_ref[...].reshape(o_ref.shape).astype(jnp.float32)
    o_ref[...] = (jnp.tanh(a) * jax.nn.sigmoid(b)).astype(o_ref.dtype)


def _gtu_slice_kernel(x_ref, o_ref):
    # x_ref: (tm, 2C) -> o_ref: (tm, C); used when C is not lane-aligned.
    c = x_ref.shape[-1] // 2
    a = x_ref[:, :c].astype(jnp.float32)
    b = x_ref[:, c:].astype(jnp.float32)
    o_ref[...] = (jnp.tanh(a) * jax.nn.sigmoid(b)).astype(o_ref.dtype)


def gated_tanh_unit(x: jax.Array, dim: int = -1) -> jax.Array:
    """tanh(a) * sigmoid(b) where a, b = split(x, 2, axis=dim)."""
    ndim = x.ndim
    axis = dim % ndim
    two_c = x.shape[axis]
    assert two_c % 2 == 0, "split axis must have even size"
    c = two_c // 2
    itemsize = jnp.dtype(x.dtype).itemsize
    mult = _sublane_mult(itemsize)

    out_shape = x.shape[:axis] + (c,) + x.shape[axis + 1:]
    n_out = math.prod(out_shape)
    cost = pl.CostEstimate(flops=n_out,
                           transcendentals=2 * n_out,
                           bytes_accessed=3 * n_out * itemsize)

    if axis == ndim - 1:
        # --- split axis already on the lane axis: 2-D (rows, 2C) view -------
        rows = math.prod(x.shape[:axis])
        x2d = x.reshape(rows, two_c)
        row_bytes = 3 * c * itemsize           # a-row + b-row + out-row
        tm = _pick_tile(rows, row_bytes, _TILE_BUDGET_BYTES, mult,
                        prefer_split=True)
        grid = (pl.cdiv(rows, tm),)
        params = pltpu.CompilerParams(dimension_semantics=("parallel",),
                                      vmem_limit_bytes=_VMEM_LIMIT_BYTES)

        if c % 128 == 0:
            # DMA-side a/b split: each half arrives lane-0-aligned, no
            # lane-shifted slice inside the kernel.
            out2d = pl.pallas_call(
                _gtu_split_kernel,
                out_shape=jax.ShapeDtypeStruct((rows, c), x.dtype),
                grid_spec=pltpu.PrefetchScalarGridSpec(
                    num_scalar_prefetch=0,
                    grid=grid,
                    in_specs=[pl.BlockSpec((tm, c), lambda i: (i, 0)),
                              pl.BlockSpec((tm, c), lambda i: (i, 1))],
                    out_specs=pl.BlockSpec((tm, c), lambda i: (i, 0)),
                ),
                compiler_params=params,
                cost_estimate=cost,
            )(x2d, x2d)
        else:
            # C not a multiple of 128: fetch full (tm, 2C) rows, slice in-kernel.
            out2d = pl.pallas_call(
                _gtu_slice_kernel,
                out_shape=jax.ShapeDtypeStruct((rows, c), x.dtype),
                grid_spec=pltpu.PrefetchScalarGridSpec(
                    num_scalar_prefetch=0,
                    grid=grid,
                    in_specs=[pl.BlockSpec((tm, two_c), lambda i: (i, 0))],
                    out_specs=pl.BlockSpec((tm, c), lambda i: (i, 0)),
                ),
                compiler_params=params,
                cost_estimate=cost,
            )(x2d)
        return out2d.reshape(out_shape)

    # --- interior split axis (e.g. NCHW dim=1): no transpose, free reshape ---
    # View x as (lead, 2, C, post); the a/b split becomes block index 0 vs 1
    # along the size-2 axis and the (large) trailing dims stay lane-dense.
    lead = math.prod(x.shape[:axis])
    post = math.prod(x.shape[axis + 1:])
    x4 = x.reshape(lead, 2, c, post)

    tp = _pick_tile(post, 3 * itemsize * mult, _TILE_BUDGET_BYTES, 128)
    tc = _pick_tile(c, 3 * itemsize * tp, _TILE_BUDGET_BYTES, mult,
                    prefer_split=(lead == 1))
    grid = (lead, pl.cdiv(c, tc), pl.cdiv(post, tp))

    out3d = pl.pallas_call(
        _gtu_split_kernel,
        out_shape=jax.ShapeDtypeStruct((lead, c, post), x.dtype),
        grid_spec=pltpu.PrefetchScalarGridSpec(
            num_scalar_prefetch=0,
            grid=grid,
            in_specs=[
                pl.BlockSpec((1, 1, tc, tp), lambda l, ci, pj: (l, 0, ci, pj)),
                pl.BlockSpec((1, 1, tc, tp), lambda l, ci, pj: (l, 1, ci, pj)),
            ],
            out_specs=pl.BlockSpec((1, tc, tp), lambda l, ci, pj: (l, ci, pj)),
        ),
        compiler_params=pltpu.CompilerParams(
            dimension_semantics=("parallel", "parallel", "parallel"),
            vmem_limit_bytes=_VMEM_LIMIT_BYTES),
        cost_estimate=cost,
    )(x4, x4)
    return out3d.reshape(out_shape)


def _reference(x, dim):
    a, b = jnp.split(x, 2, axis=dim)
    return jnp.tanh(a) * jax.nn.sigmoid(b)


if __name__ == "__main__":
    key = jax.random.PRNGKey(0)
    k0, k1, k2 = jax.random.split(key, 3)

    # 1) Default dim=-1 (case A, small C -> in-kernel slice path).
    x = jax.random.normal(k0, (2, 4, 16, 16), dtype=jnp.float32)
    out = jax.block_until_ready(gated_tanh_unit(x, dim=-1))
    ref = _reference(x, -1)
    assert out.shape == (2, 4, 16, 8), out.shape
    assert jnp.allclose(out, ref, atol=1e-5, rtol=1e-5)

    # 2) NCHW-style dim=1 (case B: no transpose, lane-dense H*W on lanes).
    x_nchw = jax.random.normal(k1, (2, 8, 16, 16), dtype=jnp.float32)
    out_nchw = jax.block_until_ready(gated_tanh_unit(x_nchw, dim=1))
    ref_nchw = _reference(x_nchw, 1)
    assert out_nchw.shape == (2, 4, 16, 16), out_nchw.shape
    assert jnp.allclose(out_nchw, ref_nchw, atol=1e-5, rtol=1e-5)

    # 3) dim=-1 with lane-aligned C (DMA-side a/b split path).
    x_wide = jax.random.normal(k2, (16, 256), dtype=jnp.float32)
    out_wide = jax.block_until_ready(gated_tanh_unit(x_wide, dim=-1))
    ref_wide = _reference(x_wide, -1)
    assert out_wide.shape == (16, 128), out_wide.shape
    assert jnp.allclose(out_wide, ref_wide, atol=1e-5, rtol=1e-5)

    print("KERNEL_OK")
</pallas_src>

<mosaic_0001>
module attributes {stable_mosaic.version = 11 : i64} {
  func.func @_gtu_slice_kernel(%arg0: i32, %arg1: memref<64x16xf32, #tpu.memory_space<vmem>>, %arg2: memref<64x8xf32, #tpu.memory_space<vmem>>) attributes {dimension_semantics = [#tpu.dimension_semantics<parallel>], iteration_bounds = array<i64: 2>, scalar_prefetch = 0 : i64, scratch_operands = 0 : i64, tpu.core_type = #tpu.core_type<tc>, window_params = [{transform_indices = @transform_0, window_bounds = array<i64: 64, 16>}, {transform_indices = @transform_1, window_bounds = array<i64: 64, 8>}]} {
    %c0 = arith.constant 0 : index
    %c0_0 = arith.constant 0 : index
    %0 = vector.load %arg1[%c0, %c0_0] : memref<64x16xf32, #tpu.memory_space<vmem>>, vector<64x8xf32>
    %c0_1 = arith.constant 0 : index
    %c8 = arith.constant 8 : index
    %1 = vector.load %arg1[%c0_1, %c8] : memref<64x16xf32, #tpu.memory_space<vmem>>, vector<64x8xf32>
    %2 = math.tanh %0 : vector<64x8xf32>
    %3 = arith.negf %1 : vector<64x8xf32>
    %4 = math.exp %3 : vector<64x8xf32>
    %cst = arith.constant 1.000000e+00 : f32
    %5 = vector.broadcast %cst : f32 to vector<64x8xf32>
    %6 = arith.addf %5, %4 : vector<64x8xf32>
    %7 = arith.divf %5, %6 : vector<64x8xf32>
    %8 = arith.mulf %2, %7 : vector<64x8xf32>
    %c0_2 = arith.constant 0 : index
    %c0_3 = arith.constant 0 : index
    %9 = vector.load %arg2[%c0_2, %c0_3] : memref<64x8xf32, #tpu.memory_space<vmem>>, vector<64x8xf32>
    tpu.vector_store %arg2[%c0_2, %c0_3], %8 {strides = array<i32>} : memref<64x8xf32, #tpu.memory_space<vmem>>, vector<64x8xf32>,
    return
  }
  func.func @transform_0(%arg0: i32) -> (i32, i32) {
    %c0_i32 = arith.constant 0 : i32
    %c0_i32_0 = arith.constant 0 : i32
    return %arg0, %c0_i32 : i32, i32
  }
  func.func @transform_1(%arg0: i32) -> (i32, i32) {
    %c0_i32 = arith.constant 0 : i32
    %c0_i32_0 = arith.constant 0 : i32
    return %arg0, %c0_i32 : i32, i32
  }
}

</mosaic_0001>

<bundles_post_ra>
// kernel: tpu_custom_call.1
= control target key start
LH: loop header
LB: loop body
LE: loop exit
PB: predicated region body
PF: predicated region fallthrough
CT: control target
= control target key end

     0   :  { %s384_s6 = smov 0   ;;  %s442_s0 = inlined_call_operand.vmem [shape: f32[128,16], index: 0, kind: input, shape index: {}]   ;;  %s443_s1 = inlined_call_operand.vmem [shape: f32[128,8], index: 1, kind: output, shape index: {}]  }
   0x1 LB: > { %s289_s7 = sadd.s32 4294967295, %s371_s6   ;;  %p293_p0 = scmp.ge.s32.totalorder %s371_s6, 1  ;;  %s371_s6 = sphi %s384_s6, %s11_s6  }
   0x2   : > { %p88_p1 = scmp.lt.s32.totalorder %s371_s6, 3 }
   0x4   : > { %p89_p2 = pnand %p293_p0, %p88_p1 }
   0x5   : > { %s294_s8 = sshll.u32 (!%p89_p2), %s289_s7, 3  ;;  %s373_s13 = smov (!%p89_p2), 120   ;;  %vm224_vm0 = vcmask (!%p89_p2), 64512  }
   0x6   : > { %92 = sbr.rel (%p89_p2) target bundleno = 174 (0xae), region = 24  ;;  %p109_p3 = scmp.lt.s32.totalorder (!%p89_p2), %s294_s8, 15 }
   0xd   : > { %s445_s8 = smov (!%p109_p3, %s294_s8), 15 }
   0xe   : > { %s295_s9 = sshll.u32 %s445_s8, 3 }
   0xf   : > { %s112_s12 = scalar_lea.vmem %s442_s0, %s295_s9  ;;  %s420_s16 = scalar_lea.vmem %s443_s1, %s295_s9 }
  0x10   : > { %v400_v0 = vld [vmem:[%s112_s12 + $0x10] sm:$0xff]  ;;  %v402_v1 = vld [vmem:[%s112_s12] sm:$0xff]  ;;  %v404_v2 = vld [vmem:[%s112_s12 + $0x18] sm:$0xff] }
  0x11   : > { %v300_v3 = vmul.f32 -1.442695, %v400_v0  ;;  %v298_v4 = vmul.f32 -1.442695, %v402_v1  ;;  %v301_v5 = vmul.f32 -1.442695, %v404_v2 }
  0x12   : > { %v121_v6 = vld [vmem:[%s112_s12 + $0x8] sm:$0xff]  ;;  %v124_v8 = vld [vmem:[%s112_s12 + $0x20] sm:$0xff]  ;;  %v127_v12 = vld [vmem:[%s112_s12 + $0x38] sm:$0xff] }
  0x13   : > { %v125_v7 = vld [vmem:[%s112_s12 + $0x28] sm:$0xff]  ;;  %317 = vpow2.f32 %v300_v3  ;;  %v299_v9 = vmul.f32 -1.442695, %v121_v6  ;;  %v302_v11 = vmul.f32 -1.442695, %v124_v8  ;;  %v409_v13 = vld [vmem:[%s112_s12 + $0x30] sm:$0xff] }
  0x14   : > { %v303_v10 = vmul.f32 -1.442695, %v125_v7  ;;  %319 = vpow2.f32 %v298_v4  ;;  %v305_v14 = vmul.f32 -1.442695, %v127_v12  ;;  %v304_v15 = vmul.f32 -1.442695, %v409_v13 }
  0x15   : > { %321 = vpow2.f32 %v301_v5 }
  0x16   : > { %323 = vpow2.f32 %v299_v9 }
  0x17   : > { %325 = vpow2.f32 %v303_v10 }
  0x18   : > { %327 = vpow2.f32 %v302_v11 }
  0x19   : > { %329 = vpow2.f32 %v305_v14 }
  0x1a   : > { %331 = vpow2.f32 %v304_v15 }
  0x1d   : > { %v318_v16 = vpop.eup %317 }
  0x1e   : > { %v320_v17 = vpop.eup %319  ;;  %v162_v18 = vadd.f32 1.0, %v318_v16 }
  0x1f   : > { %v322_v19 = vpop.eup %321  ;;  %v160_v20 = vadd.f32 1.0, %v320_v17 }
  0x20   : > { %v324_v21 = vpop.eup %323  ;;  %333 = vrcp.f32 %v162_v18  ;;  %v163_v22 = vadd.f32 1.0, %v322_v19 }
  0x21   : > { %v326_v23 = vpop.eup %325  ;;  %335 = vrcp.f32 %v160_v20  ;;  %v161_v24 = vadd.f32 1.0, %v324_v21 }
  0x22   : > { %v328_v25 = vpop.eup %327  ;;  %337 = vrcp.f32 %v163_v22  ;;  %v165_v26 = vadd.f32 1.0, %v326_v23 }
  0x23   : > { %v330_v27 = vpop.eup %329  ;;  %339 = vrcp.f32 %v161_v24  ;;  %v164_v28 = vadd.f32 1.0, %v328_v25 }
  0x24   : > { %v332_v29 = vpop.eup %331  ;;  %341 = vrcp.f32 %v165_v26  ;;  %v167_v30 = vadd.f32 1.0, %v330_v27 }
  0x25   : > { %343 = vrcp.f32 %v164_v28  ;;  %v166_v31 = vadd.f32 1.0, %v332_v29 }
  0x26   : > { %345 = vrcp.f32 %v167_v30 }
  0x27   : > { %347 = vrcp.f32 %v166_v31 }
  0x28   : > { %349 = vtanh.f32 %v400_v0 }
  0x29   : > { %351 = vtanh.f32 %v402_v1 }
  0x2a   : > { %v334_v32 = vpop.eup %333  ;;  %353 = vtanh.f32 %v404_v2 }
  0x2b   : > { %v336_v33 = vpop.eup %335  ;;  %196 = vrot.lane.b32.xlu1 %v334_v32, %s373_s13  ;;  %355 = vtanh.f32 %v121_v6 }
  0x2c   : > { %v338_v34 = vpop.eup %337  ;;  %192 = vrot.lane.b32.xlu0 %v336_v33, %s373_s13  ;;  %357 = vtanh.f32 %v125_v7 }
  0x2d   : > { %v340_v35 = vpop.eup %339  ;;  %359 = vtanh.f32 %v124_v8 }
  0x2e   : > { %v342_v36 = vpop.eup %341  ;;  %361 = vtanh.f32 %v127_v12 }
  0x2f   : > { %198 = vrot.lane.b32.xlu1 %v338_v34, %s373_s13  ;;  %v344_v37 = vpop.eup %343  ;;  %363 = vtanh.f32 %v409_v13 }
  0x30   : > { %194 = vrot.lane.b32.xlu0 %v340_v35, %s373_s13  ;;  %v346_v38 = vpop.eup %345 }
  0x31   : > { %v348_v39 = vpop.eup %347 }
  0x32   : > { %v350_v40 = vpop.eup %349 }
  0x33   : > { %202 = vrot.lane.b32.xlu1 %v342_v36, %s373_s13  ;;  %v352_v41 = vpop.eup %351 }
  0x34   : > { %200 = vrot.lane.b32.xlu0 %v344_v37, %s373_s13  ;;  %v354_v45 = vpop.eup %353 }
  0x35   : > { %v356_v47 = vpop.eup %355 }
  0x36   : > { %v358_v51 = vpop.eup %357 }
  0x37   : > { %206 = vrot.lane.b32.xlu1 %v346_v38, %s373_s13  ;;  %v360_v53 = vpop.eup %359 }
  0x38   : > { %204 = vrot.lane.b32.xlu0 %v348_v39, %s373_s13  ;;  %v362_v57 = vpop.eup %361 }
  0x39   : > { %v364_v59 = vpop.eup %363 }
  0x9d   : > { %v197_v42 = vpop.permute.xlu1 %196 }
  0x9e   : > { %v218_v43 = vmul.f32 %v350_v40, %v197_v42  ;;  %v193_v44 = vpop.permute.xlu0 %192 }
  0x9f   : > { %v216_v46 = vmul.f32 %v352_v41, %v193_v44 }
  0xa0   : > { %227 = vst.msk [vmem:[%s420_s16 + $0x10] sm:$0xff] %vm224_vm0, %v218_v43 }
  0xa1   : > { %225 = vst.msk [vmem:[%s420_s16] sm:$0xff] %vm224_vm0, %v216_v46  ;;  %v199_v48 = vpop.permute.xlu1 %198 }
  0xa2   : > { %v219_v49 = vmul.f32 %v354_v45, %v199_v48  ;;  %v195_v50 = vpop.permute.xlu0 %194 }
  0xa3   : > { %v217_v52 = vmul.f32 %v356_v47, %v195_v50 }
  0xa4   : > { %228 = vst.msk [vmem:[%s420_s16 + $0x18] sm:$0xff] %vm224_vm0, %v219_v49 }
  0xa5   : > { %226 = vst.msk [vmem:[%s420_s16 + $0x8] sm:$0xff] %vm224_vm0, %v217_v52  ;;  %v203_v54 = vpop.permute.xlu1 %202 }
  0xa6   : > { %v221_v55 = vmul.f32 %v358_v51, %v203_v54  ;;  %v201_v56 = vpop.permute.xlu0 %200 }
  0xa7   : > { %v220_v58 = vmul.f32 %v360_v53, %v201_v56 }
  0xa8   : > { %230 = vst.msk [vmem:[%s420_s16 + $0x28] sm:$0xff] %vm224_vm0, %v221_v55 }
  0xa9   : > { %229 = vst.msk [vmem:[%s420_s16 + $0x20] sm:$0xff] %vm224_vm0, %v220_v58  ;;  %v207_v60 = vpop.permute.xlu1 %206 }
  0xaa   : > { %v223_v61 = vmul.f32 %v362_v57, %v207_v60  ;;  %v205_v62 = vpop.permute.xlu0 %204 }
  0xab   : > { %v222_v63 = vmul.f32 %v364_v59, %v205_v62 }
  0xac   : > { %232 = vst.msk [vmem:[%s420_s16 + $0x38] sm:$0xff] %vm224_vm0, %v223_v61 }
  0xad   : > { %231 = vst.msk [vmem:[%s420_s16 + $0x30] sm:$0xff] %vm224_vm0, %v222_v63 }
  0xae PF: > { %s11_s6 = sadd.s32 1, %s371_s6  }
  0xaf   : > { %p8_p4 = scmp.ge.s32.totalorder %s11_s6, 4  }
  0xb1   :  { %10 = sbr.rel (!%p8_p4) target bundleno = 1 (0x1), region = 54 }

</bundles_post_ra>
